<compile_context>
chip_gen: v7x
topology: tpu7x:2x2x1
jax: 0.10.0
libtpu: 0.0.40
codegen_flags: <defaults>
</compile_context>

<pallas_src>
import functools

import jax
import jax.numpy as jnp
from jax import lax
from jax.experimental import pallas as pl
from jax.experimental.pallas import tpu as pltpu


def _round_up(x, m):
    return ((x + m - 1) // m) * m


def _cdiv(a, b):
    return -(-a // b)


def _green_loss_kernel(g_ref, u_ref, f_ref, out_ref, acc_ref,
                       *, m_tile, chunk, m_total, steps, nsample):
    """Grid point (c, i) processes rows [(c*steps + i)*m_tile, +m_tile) of M.

    g_ref:   (m_tile, k_pad)   rows of G laid out as (Nx*Nt, K) with K zero-padded
    u_ref:   (m_tile, nsample) matching rows of u
    f_ref:   (k_pad, nsample)  f weights (K rows >= Nx are zero), resident
    out_ref: (1, 8, nsample)   per-core partials; row 0 = num, row 1 = den
    acc_ref: (8, nsample) VMEM running per-sample column sums (rows 0/1 used)
    """
    c = pl.program_id(0)
    i = pl.program_id(1)

    @pl.when(i == 0)
    def _():
        acc_ref[...] = jnp.zeros_like(acc_ref)

    f_blk = f_ref[...]                                    # (k_pad, nsample)
    row0 = (c * steps + i) * m_tile                       # UNclamped global row offset
    n_chunks = m_tile // chunk

    def body(j, carry):
        num, den = carry
        off = pl.multiple_of(j * chunk, 8)
        g_chunk = g_ref[pl.ds(off, chunk), :]             # (chunk, k_pad)
        u_chunk = u_ref[pl.ds(off, chunk), :]             # (chunk, nsample)
        # pred[m, s] = sum_k G2[m, k] * f[k, s] -- plain MXU matmul, K lane-aligned.
        pred = jnp.dot(g_chunk, f_blk, preferred_element_type=jnp.float32)
        diff = u_chunk - pred
        # Mask rows past the true M extent (partial last block, or a duplicate
        # clamped block whose unclamped offset is >= m_total -> contributes 0).
        row = row0 + off + lax.broadcasted_iota(jnp.int32, (chunk, 1), 0)
        valid = row < m_total
        num = num + jnp.sum(jnp.where(valid, diff * diff, 0.0),
                            axis=0, keepdims=True)
        den = den + jnp.sum(jnp.where(valid, u_chunk * u_chunk, 0.0),
                            axis=0, keepdims=True)
        return num, den

    zero = jnp.zeros((1, nsample), jnp.float32)
    num, den = lax.fori_loop(0, n_chunks, body, (zero, zero),
                             unroll=2 if n_chunks >= 2 else 1)
    acc_ref[0:1, :] += num
    acc_ref[1:2, :] += den

    @pl.when(i == steps - 1)
    def _():
        out_ref[0] = acc_ref[...]


@functools.partial(jax.jit, static_argnames=("nsample", "nx", "nt"))
def green_loss_time(g_output, u, f, *, nsample, nx, nt):
    """Pallas implementation of GreenLossTime.forward."""
    m_total = nx * nt
    k_pad = _round_up(nx, 128)     # contraction dim: lane aligned, no garbage lanes

    # Single fused layout copy: (a, b, t) -> (a*t, b) with b zero-padded to k_pad.
    # This replaces the two jnp.pad copies of v2 (traffic-neutral per review).
    g3 = g_output.reshape(nx, nx, nt).astype(jnp.float32)
    g2 = jnp.transpose(g3, (0, 2, 1)).reshape(m_total, nx)
    g2 = jnp.pad(g2, ((0, 0), (0, k_pad - nx)))           # (M, k_pad)

    u2 = u.reshape(m_total, nsample).astype(jnp.float32)  # already this shape: no copy
    f2 = jnp.pad(f.reshape(nx, nsample).astype(jnp.float32),
                 ((0, k_pad - nx), (0, 0)))                # (k_pad, nsample), tiny

    # ~4 blocks total over M (2 per core index); chunk the block inside the
    # kernel so intermediates stay small.
    m_tile = _round_up(_cdiv(m_total, 4), 8)
    chunk = 512
    if m_tile >= chunk:
        m_tile = _round_up(m_tile, chunk)
    else:
        chunk = m_tile
    n_blocks = _cdiv(m_total, m_tile)
    steps = _cdiv(n_blocks, 2)

    def m_index(c, i):
        # Clamp duplicate/out-of-range block indices into range; the kernel's
        # row mask (computed from the UNclamped offset) zeroes their contribution.
        return (jnp.minimum(c * steps + i, n_blocks - 1), 0)

    kernel = functools.partial(
        _green_loss_kernel, m_tile=m_tile, chunk=chunk,
        m_total=m_total, steps=steps, nsample=nsample)

    flops = 2 * m_total * k_pad * nsample
    bytes_accessed = 4 * (m_total * k_pad + m_total * nsample
                          + k_pad * nsample + 2 * 8 * nsample)

    out = pl.pallas_call(
        kernel,
        out_shape=jax.ShapeDtypeStruct((2, 8, nsample), jnp.float32),
        grid_spec=pltpu.PrefetchScalarGridSpec(
            num_scalar_prefetch=0,
            grid=(2, steps),
            in_specs=[
                pl.BlockSpec((m_tile, k_pad), m_index),          # G2 slab
                pl.BlockSpec((m_tile, nsample), m_index),        # u slab
                pl.BlockSpec((k_pad, nsample), lambda c, i: (0, 0)),  # f (resident)
            ],
            out_specs=pl.BlockSpec((1, 8, nsample), lambda c, i: (c, 0, 0)),
            scratch_shapes=[
                pltpu.VMEM((8, nsample), jnp.float32),   # rows 0/1: num/den partials
            ],
        ),
        compiler_params=pltpu.CompilerParams(
            # Leading axis splits the M range across TensorCores on megacore
            # parts (v7x); the inner axis carries the accumulator -> arbitrary.
            dimension_semantics=("parallel", "arbitrary"),
        ),
        cost_estimate=pl.CostEstimate(flops=flops, transcendentals=0,
                                      bytes_accessed=bytes_accessed),
    )(g2, u2, f2)

    # Tiny epilogue: combine per-core partials, divide, mean (matches PyTorch).
    # Note: a sample column with sum(u^2) == 0 yields Inf/NaN, same as PyTorch.
    num = out[:, 0, :].sum(axis=0)                         # (nsample,)
    den = out[:, 1, :].sum(axis=0)
    return jnp.mean(num / den * 100.0)


def _reference_loss(g_output, u, f, *, nsample, nx, nt):
    f_w = f.reshape(nx, nsample)
    pred = jnp.tensordot(g_output.reshape(nx, nx, nt), f_w, axes=([1], [0]))
    pred = pred.reshape(nx * nt, nsample)
    loss = (jnp.sum(jnp.square(u - pred), axis=0)
            / jnp.sum(jnp.square(u), axis=0) * 100.0)
    return jnp.mean(loss)


if __name__ == "__main__":
    # Small shapes consistent with the module structure (module default is
    # Nsample=100, Nx=101, Nt=101).  The second config uses odd sizes so the
    # tail-masking / clamped-block paths hit at the real shapes are exercised.
    configs = [
        dict(nsample=8, nx=16, nt=16),
        dict(nsample=10, nx=13, nt=11),
    ]

    key = jax.random.PRNGKey(0)
    for cfg in configs:
        nsample, nx, nt = cfg["nsample"], cfg["nx"], cfg["nt"]
        key, kg, ku, kf = jax.random.split(key, 4)
        g_output = jax.random.normal(kg, (nx * nx * nt,), dtype=jnp.float32)
        u = jax.random.normal(ku, (nx * nt, nsample), dtype=jnp.float32)
        f = jax.random.normal(kf, (nx, nsample), dtype=jnp.float32)

        loss = green_loss_time(g_output, u, f, nsample=nsample, nx=nx, nt=nt)
        loss = jax.block_until_ready(loss)

        ref = _reference_loss(g_output, u, f, nsample=nsample, nx=nx, nt=nt)
        assert jnp.allclose(loss, ref, rtol=2e-3, atol=2e-3), (cfg, loss, ref)

    print("KERNEL_OK")
</pallas_src>

<mosaic_0001>
module attributes {stable_mosaic.version = 11 : i64} {
  func.func @_green_loss_kernel(%arg0: i32, %arg1: i32, %arg2: memref<64x128xf32, #tpu.memory_space<vmem>>, %arg3: memref<64x8xf32, #tpu.memory_space<vmem>>, %arg4: memref<128x8xf32, #tpu.memory_space<vmem>>, %arg5: memref<1x8x8xf32, #tpu.memory_space<vmem>>, %arg6: memref<8x8xf32, #tpu.memory_space<vmem>>) attributes {dimension_semantics = [#tpu.dimension_semantics<parallel>, #tpu.dimension_semantics<arbitrary>], iteration_bounds = array<i64: 2, 2>, scalar_prefetch = 0 : i64, scratch_operands = 1 : i64, tpu.core_type = #tpu.core_type<tc>, window_params = [{transform_indices = @transform_0, window_bounds = array<i64: 64, 128>}, {transform_indices = @transform_1, window_bounds = array<i64: 64, 8>}, {pipeline_mode = #tpu.pipeline_mode<synchronous>, transform_indices = @transform_2, window_bounds = array<i64: 128, 8>}, {transform_indices = @transform_3, window_bounds = array<i64: 1, 8, 8>}]} {
    %c0_i32 = arith.constant 0 : i32
    %0 = arith.cmpi eq, %arg1, %c0_i32 : i32
    %1 = arith.extui %0 : i1 to i32
    %c0_i32_0 = arith.constant 0 : i32
    %2 = arith.cmpi ne, %1, %c0_i32_0 : i32
    scf.if %2 {
      %cst_20 = arith.constant 0.000000e+00 : f32
      %47 = vector.broadcast %cst_20 : f32 to vector<8x8xf32>
      %c0_21 = arith.constant 0 : index
      %c0_22 = arith.constant 0 : index
      %48 = vector.load %arg6[%c0_21, %c0_22] : memref<8x8xf32, #tpu.memory_space<vmem>>, vector<8x8xf32>
      tpu.vector_store %arg6[%c0_21, %c0_22], %47 {strides = array<i32>} : memref<8x8xf32, #tpu.memory_space<vmem>>, vector<8x8xf32>,
    } else {
    }
    %c0 = arith.constant 0 : index
    %c0_1 = arith.constant 0 : index
    %3 = vector.load %arg4[%c0, %c0_1] : memref<128x8xf32, #tpu.memory_space<vmem>>, vector<128x8xf32>
    %c2_i32 = arith.constant 2 : i32
    %4 = arith.muli %arg0, %c2_i32 : i32
    %5 = arith.addi %4, %arg1 : i32
    %c64_i32 = arith.constant 64 : i32
    %6 = arith.muli %5, %c64_i32 : i32
    %cst = arith.constant 0.000000e+00 : f32
    %7 = vector.broadcast %cst : f32 to vector<1x8xf32>
    %c0_i32_2 = arith.constant 0 : i32
    %c64_i32_3 = arith.constant 64 : i32
    %8 = arith.muli %c0_i32_2, %c64_i32_3 : i32
    %9 = tpu.assume_multiple %8, 8 : i32
    %10 = arith.index_cast %9 : i32 to index
    %c0_4 = arith.constant 0 : index
    %11 = vector.load %arg2[%10, %c0_4] : memref<64x128xf32, #tpu.memory_space<vmem>>, vector<64x128xf32>
    %12 = arith.index_cast %9 : i32 to index
    %c0_5 = arith.constant 0 : index
    %13 = vector.load %arg3[%12, %c0_5] : memref<64x8xf32, #tpu.memory_space<vmem>>, vector<64x8xf32>
    %cst_6 = arith.constant dense<0.000000e+00> : vector<64x8xf32>
    %14 = tpu.matmul %11, %3, %cst_6 {dimension_numbers = #tpu.dot_dimension_numbers<[1], [0], [0], [1], [0, 0, 1, 1], [], []>} : vector<64x128xf32>, vector<128x8xf32>, vector<64x8xf32> -> vector<64x8xf32>
    %15 = arith.subf %13, %14 : vector<64x8xf32>
    %16 = arith.addi %6, %9 : i32
    %17 = tpu.iota {dimensions = array<i32: 0>} : vector<64x1xi32>
    %18 = vector.broadcast %16 : i32 to vector<64x1xi32>
    %19 = arith.addi %18, %17 : vector<64x1xi32>
    %c256_i32 = arith.constant 256 : i32
    %20 = vector.broadcast %c256_i32 : i32 to vector<64x1xi32>
    %21 = arith.cmpi slt, %19, %20 : vector<64x1xi32>
    %22 = arith.mulf %15, %15 : vector<64x8xf32>
    %cst_7 = arith.constant 0.000000e+00 : f32
    %23 = vector.shape_cast %21 : vector<64x1xi1> to vector<64x1xi1>
    %24 = vector.broadcast %23 : vector<64x1xi1> to vector<64x8xi1>
    %25 = vector.broadcast %cst_7 : f32 to vector<64x8xf32>
    %26 = arith.select %24, %22, %25 : vector<64x8xi1>, vector<64x8xf32>
    %cst_8 = arith.constant dense<0.000000e+00> : vector<8xf32>
    %27 = vector.multi_reduction <add>, %26, %cst_8 [0] : vector<64x8xf32> to vector<8xf32>
    %28 = vector.shape_cast %27 : vector<8xf32> to vector<1x8xf32>
    %29 = arith.addf %7, %28 : vector<1x8xf32>
    %30 = arith.mulf %13, %13 : vector<64x8xf32>
    %cst_9 = arith.constant 0.000000e+00 : f32
    %31 = vector.shape_cast %21 : vector<64x1xi1> to vector<64x1xi1>
    %32 = vector.broadcast %31 : vector<64x1xi1> to vector<64x8xi1>
    %33 = vector.broadcast %cst_9 : f32 to vector<64x8xf32>
    %34 = arith.select %32, %30, %33 : vector<64x8xi1>, vector<64x8xf32>
    %cst_10 = arith.constant dense<0.000000e+00> : vector<8xf32>
    %35 = vector.multi_reduction <add>, %34, %cst_10 [0] : vector<64x8xf32> to vector<8xf32>
    %36 = vector.shape_cast %35 : vector<8xf32> to vector<1x8xf32>
    %37 = arith.addf %7, %36 : vector<1x8xf32>
    %c1_i32 = arith.constant 1 : i32
    %c0_11 = arith.constant 0 : index
    %c0_12 = arith.constant 0 : index
    %38 = vector.load %arg6[%c0_11, %c0_12] : memref<8x8xf32, #tpu.memory_space<vmem>>, vector<1x8xf32>
    %39 = arith.addf %38, %29 : vector<1x8xf32>
    %c0_13 = arith.constant 0 : index
    %c0_14 = arith.constant 0 : index
    %40 = vector.load %arg6[%c0_13, %c0_14] : memref<8x8xf32, #tpu.memory_space<vmem>>, vector<1x8xf32>
    tpu.vector_store %arg6[%c0_13, %c0_14], %39 {strides = array<i32>} : memref<8x8xf32, #tpu.memory_space<vmem>>, vector<1x8xf32>,
    %c1 = arith.constant 1 : index
    %c0_15 = arith.constant 0 : index
    %41 = vector.load %arg6[%c1, %c0_15] : memref<8x8xf32, #tpu.memory_space<vmem>>, vector<1x8xf32>
    %42 = arith.addf %41, %37 : vector<1x8xf32>
    %c1_16 = arith.constant 1 : index
    %c0_17 = arith.constant 0 : index
    %43 = vector.load %arg6[%c1_16, %c0_17] : memref<8x8xf32, #tpu.memory_space<vmem>>, vector<1x8xf32>
    tpu.vector_store %arg6[%c1_16, %c0_17], %42 {strides = array<i32>} : memref<8x8xf32, #tpu.memory_space<vmem>>, vector<1x8xf32>,
    %c1_i32_18 = arith.constant 1 : i32
    %44 = arith.cmpi eq, %arg1, %c1_i32_18 : i32
    %45 = arith.extui %44 : i1 to i32
    %c0_i32_19 = arith.constant 0 : i32
    %46 = arith.cmpi ne, %45, %c0_i32_19 : i32
    scf.if %46 {
      %c0_20 = arith.constant 0 : index
      %c0_21 = arith.constant 0 : index
      %47 = vector.load %arg6[%c0_20, %c0_21] : memref<8x8xf32, #tpu.memory_space<vmem>>, vector<8x8xf32>
      %c0_22 = arith.constant 0 : index
      %c0_23 = arith.constant 0 : index
      %c0_24 = arith.constant 0 : index
      %48 = vector.load %arg5[%c0_22, %c0_23, %c0_24] : memref<1x8x8xf32, #tpu.memory_space<vmem>>, vector<1x8x8xf32>
      %49 = vector.shape_cast %48 : vector<1x8x8xf32> to vector<8x8xf32>
      %50 = vector.shape_cast %47 : vector<8x8xf32> to vector<1x8x8xf32>
      tpu.vector_store %arg5[%c0_22, %c0_23, %c0_24], %50 {strides = array<i32>} : memref<1x8x8xf32, #tpu.memory_space<vmem>>, vector<1x8x8xf32>,
    } else {
    }
    return
  }
  func.func @transform_0(%arg0: i32, %arg1: i32) -> (i32, i32) {
    %c2_i32 = arith.constant 2 : i32
    %0 = arith.muli %arg0, %c2_i32 : i32
    %1 = arith.addi %0, %arg1 : i32
    %c3_i32 = arith.constant 3 : i32
    %2 = arith.minsi %1, %c3_i32 : i32
    %c0_i32 = arith.constant 0 : i32
    %c0_i32_0 = arith.constant 0 : i32
    return %2, %c0_i32 : i32, i32
  }
  func.func @transform_1(%arg0: i32, %arg1: i32) -> (i32, i32) {
    %c2_i32 = arith.constant 2 : i32
    %0 = arith.muli %arg0, %c2_i32 : i32
    %1 = arith.addi %0, %arg1 : i32
    %c3_i32 = arith.constant 3 : i32
    %2 = arith.minsi %1, %c3_i32 : i32
    %c0_i32 = arith.constant 0 : i32
    %c0_i32_0 = arith.constant 0 : i32
    return %2, %c0_i32 : i32, i32
  }
  func.func @transform_2(%arg0: i32, %arg1: i32) -> (i32, i32) {
    %c0_i32 = arith.constant 0 : i32
    %c0_i32_0 = arith.constant 0 : i32
    %c0_i32_1 = arith.constant 0 : i32
    return %c0_i32, %c0_i32_0 : i32, i32
  }
  func.func @transform_3(%arg0: i32, %arg1: i32) -> (i32, i32, i32) {
    %c0_i32 = arith.constant 0 : i32
    %c0_i32_0 = arith.constant 0 : i32
    %c0_i32_1 = arith.constant 0 : i32
    return %arg0, %c0_i32, %c0_i32_0 : i32, i32, i32
  }
}

</mosaic_0001>

<bundles_post_ra>
// kernel: green_loss_time.1
= control target key start
LH: loop header
LB: loop body
LE: loop exit
PB: predicated region body
PF: predicated region fallthrough
CT: control target
= control target key end

     0   :  { %s864_s12 = smov 0   ;;  %s866_s13 = smov 0   ;;  %s1089_s0 = inlined_call_operand.vmem [shape: f32[256,128], index: 0, kind: input, shape index: {}]   ;;  %s1090_s1 = inlined_call_operand.vmem [shape: f32[256,8], index: 1, kind: input, shape index: {}]   ;;  %s1091_s2 = inlined_call_operand.vmem [shape: f32[128,8], index: 2, kind: input, shape index: {}]   ;;  %s1092_s3 = inlined_call_operand.vmem [shape: f32[2,8,8], index: 3, kind: output, shape index: {}]  }
   0x1   :  { %s868_s14 = smov 0   ;;  %s870_s15 = smov 0  }
   0x2   :  { %s872_s16 = smov 0  }
   0x3 LB: > { %s22_s17 = sadd.s32 1, %s833_s14  ;;  %s25_s18 = sadd.s32 1, %s837_s15  ;;  %s841_s16 = sphi %s872_s16, %s13_s16   ;;  %s837_s15 = sphi %s870_s15, %s1096_s15   ;;  %s833_s14 = sphi %s868_s14, %s1095_s14   ;;  %s829_s13 = sphi %s866_s13, %s1094_s13   ;;  %s825_s12 = sphi %s864_s12, %s1093_s12  }
   0x4   : > { %p23_p0 = scmp.ge.s32.totalorder %s22_s17, 2  ;;  %p632_p1 = scmp.ge.s32.totalorder %s841_s16, 1 }
   0x5   : > { %p193_p2 = scmp.lt.s32.totalorder %s841_s16, 5 }
   0x6   : > { %s1098_s17 = smov (%p23_p0, %s22_s17), 0  ;;  %s1100_s18 = smov (!%p23_p0, %s25_s18), %s837_s15 }
   0x7   : > { %p194_p3 = pnand %p632_p1, %p193_p2  ;;  %p27_p4 = scmp.ge.s32.totalorder %s1100_s18, 2 }
   0x8   : > { %s633_s19 = sshll.u32 (!%p194_p3), %s829_s13, 1  ;;  %p257_p5 = scmp.lt.s32.totalorder (!%p194_p3), %s829_s13, 1 }
   0x9   : > { %s1102_s18 = smov (%p27_p4, %s1100_s18), 0  ;;  %197 = sbr.rel (%p194_p3) target bundleno = 318 (0x13e), region = 32 }
   0xa   : > { %s897_s20 = sadd.s32 (!%p194_p3), %s825_s12, %s633_s19  ;;  %p640_p8 = scmp.ne.s32.totalorder (!%p194_p3), %s825_s12, 0 }
   0xb   : > { %p231_p6 = scmp.lt.s32.totalorder (!%p194_p3), %s897_s20, 3 }
  0x10   : > { %s1104_s13 = smov (!%p257_p5, %s829_s13), 1  ;;  %vm265_vm0 = vcmask (!%p640_p8), 64512   ;;  %v843_v0 = vmov (!%p640_p8), 0.0  }
  0x11   : > { %s232_s21 = scalar_select %p231_p6, %s897_s20, 3 }
  0x12   : > { %s639_s22 = sshll.u32 %s1104_s13, 3  ;;  %264 = sbr.rel (%p640_p8) target bundleno = 25 (0x19), region = 36  ;;  %266 = vst.msk [vmem:[#allocation2] sm:$0xff] (!%p640_p8), %vm265_vm0, %v843_v0 }
  0x13   : > { %s634_s23 = sshll.u32 %s232_s21, 3  ;;  %s904_s26 = scalar_lea.vmem %s1092_s3, %s639_s22 }
  0x14   : > { %p234_p7 = scmp.lt.s32.totalorder %s634_s23, 31 }
  0x16   : > { %s1106_s23 = smov (!%p234_p7, %s634_s23), 31 }
  0x17   : > { %s635_s27 = sshll.u32 %s1106_s23, 3 }
  0x18   : > { %s909_s30 = scalar_lea.vmem %s1089_s0, %s635_s27  ;;  %s914_s6 = scalar_lea.vmem %s1090_s1, %s635_s27 }
  0x19 PF: > { %v267_v1 = vld [vmem:[%s1091_s2] sm:$0xff]  ;;  %v268_v2 = vld [vmem:[%s1091_s2 + $0x8] sm:$0xff]  ;;  %v269_v3 = vld [vmem:[%s1091_s2 + $0x10] sm:$0xff]  ;;  %v416_v33 = vlaneseq  ;;  %s642_s4 = sshll.u32 %s897_s20, 6  ;;  %vm474_vm3 = vcmask 64512   ;;  %vm537_vm10 = vcmask 57344  }
  0x1a   : > { %v714_v4 = vpack.c.bf16 %v268_v2, %v267_v1  ;;  %v270_v5 = vld [vmem:[%s1091_s2 + $0x18] sm:$0xff]  ;;  %v271_v7 = vld [vmem:[%s1091_s2 + $0x20] sm:$0xff]  ;;  %v272_v8 = vld [vmem:[%s1091_s2 + $0x28] sm:$0xff]  ;;  %v425_v36 = vstv %s642_s4  ;;  %p643_p9 = scmp.ne.s32.totalorder %s825_s12, 1 }
  0x1b   : > { %v718_v6 = vpack.c.bf16 %v270_v5, %v269_v3  ;;  %v722_v9 = vpack.c.bf16 %v272_v8, %v271_v7  ;;  %v286_v10 = vld [vmem:[%s909_s30] sm:$0xff]  ;;  %v273_v11 = vld [vmem:[%s1091_s2 + $0x30] sm:$0xff]  ;;  %v274_v12 = vld [vmem:[%s1091_s2 + $0x38] sm:$0xff]  ;;  %v417_v34 = vshrl.u32 %v416_v33, 7 }
  0x1c   : > { %715 = vmatprep.subr.bf16.mxu0 %v714_v4  ;;  %746 = vmatprep.subr.bf16.mxu1 %v714_v4  ;;  %v290_v13 = vld [vmem:[%s909_s30 + $0x20] sm:$0xff]  ;;  %v726_v14 = vpack.c.bf16 %v274_v12, %v273_v11  ;;  %v276_v16 = vld [vmem:[%s1091_s2 + $0x48] sm:$0xff]  ;;  %v277_v18 = vld [vmem:[%s1091_s2 + $0x50] sm:$0xff] }
  0x1d   : > { %717 = vmatpush3.bf16.msra.mxu0 %v714_v4  ;;  %754 = vmatpush3.bf16.msra.mxu1 %v714_v4  ;;  %v275_v15 = vld [vmem:[%s1091_s2 + $0x40] sm:$0xff]  ;;  %v278_v19 = vld [vmem:[%s1091_s2 + $0x58] sm:$0xff]  ;;  %v280_v22 = vld [vmem:[%s1091_s2 + $0x68] sm:$0xff]  ;;  %v418_v35 = vadd.s32 8, %v417_v34  ;;  %v976_v38 = vadd.s32 %v425_v36, %v417_v34  ;;  %v420_v39 = vadd.s32 24, %v417_v34  ;;  %v419_v42 = vadd.s32 16, %v417_v34 }
  0x1e   : > { %719 = vmatprep.subr.bf16.mxu0 %v718_v6  ;;  %747 = vmatprep.subr.bf16.mxu1 %v718_v6  ;;  %v730_v17 = vpack.c.bf16 %v276_v16, %v275_v15  ;;  %v734_v20 = vpack.c.bf16 %v278_v19, %v277_v18  ;;  %v279_v21 = vld [vmem:[%s1091_s2 + $0x60] sm:$0xff]  ;;  %v281_v24 = vld [vmem:[%s1091_s2 + $0x70] sm:$0xff]  ;;  %v282_v25 = vld [vmem:[%s1091_s2 + $0x78] sm:$0xff]  ;;  %v422_v54 = vadd.s32 40, %v417_v34  ;;  %v421_v58 = vadd.s32 32, %v417_v34 }
  0x1f   : > { %702 = vmatprep.mubr.f32.mxu0 %v286_v10  ;;  %708 = vmatprep.mubr.f32.mxu1 %v290_v13  ;;  %v738_v23 = vpack.c.bf16 %v280_v22, %v279_v21  ;;  %v742_v26 = vpack.c.bf16 %v282_v25, %v281_v24  ;;  %v287_v27 = vld [vmem:[%s909_s30 + $0x8] sm:$0xff]  ;;  %v288_v29 = vld [vmem:[%s909_s30 + $0x10] sm:$0xff]  ;;  %v289_v31 = vld [vmem:[%s909_s30 + $0x18] sm:$0xff]  ;;  %v974_v37 = vadd.s32 %v425_v36, %v418_v35  ;;  %vm434_vm2 = vcmp.lt.s32.totalorder %v976_v38, 256 }
  0x20   : > { %v291_v28 = vld [vmem:[%s909_s30 + $0x28] sm:$0xff]  ;;  %v292_v30 = vld [vmem:[%s909_s30 + $0x30] sm:$0xff]  ;;  %v293_v32 = vld [vmem:[%s909_s30 + $0x38] sm:$0xff]  ;;  %v990_v45 = vadd.s32 %v425_v36, %v420_v39  ;;  %v995_v47 = vadd.s32 %v425_v36, %v419_v42  ;;  %v1016_v61 = vadd.s32 %v425_v36, %v422_v54  ;;  %v1021_v2 = vadd.s32 %v425_v36, %v421_v58 }
  0x21   : > { %721 = vmatpush3.bf16.msra.mxu0 %v718_v6  ;;  %755 = vmatpush3.bf16.msra.mxu1 %v718_v6  ;;  %v979_v40 = vld [vmem:[%s914_s6 + $0x8] sm:$0xff]  ;;  %v982_v41 = vld [vmem:[%s914_s6] sm:$0xff]  ;;  %vm435_vm1 = vcmp.lt.s32.totalorder %v974_v37, 256  ;;  %v993_v46 = vld [vmem:[%s914_s6 + $0x10] sm:$0xff]  ;;  %v424_v5 = vadd.s32 56, %v417_v34  ;;  %v423_v8 = vadd.s32 48, %v417_v34 }
  0x22   : > { %723 = vmatprep.subr.bf16.mxu0 %v722_v9  ;;  %748 = vmatprep.subr.bf16.mxu1 %v722_v9  ;;  %v498_v43 = vmul.f32 %v979_v40, %v979_v40  ;;  %v497_v44 = vmul.f32 %v982_v41, %v982_v41  ;;  %v499_v50 = vmul.f32 %v993_v46, %v993_v46  ;;  %v1006_v53 = vld [vmem:[%s914_s6 + $0x18] sm:$0xff]  ;;  %vm436_vm4 = vcmp.lt.s32.totalorder %v995_v47, 256  ;;  %v299_v60 = vld [vmem:[%s914_s6 + $0x28] sm:$0xff]  ;;  %v298_v1 = vld [vmem:[%s914_s6 + $0x20] sm:$0xff] }
  0x23   : > { %v500_v56 = vmul.f32 %v1006_v53, %v1006_v53  ;;  %vm437_vm5 = vcmp.lt.s32.totalorder %v990_v45, 256  ;;  %v502_v0 = vmul.f32 %v299_v60, %v299_v60  ;;  %vm439_vm6 = vcmp.lt.s32.totalorder %v1016_v61, 256  ;;  %v301_v11 = vld [vmem:[%s914_s6 + $0x38] sm:$0xff]  ;;  %v300_v13 = vld [vmem:[%s914_s6 + $0x30] sm:$0xff] }
  0x24   : > { %v506_v48 = vsel %vm435_vm1, %v498_v43, 0.0  ;;  %v505_v49 = vsel %vm434_vm2, %v497_v44, 0.0  ;;  %v507_v57 = vsel %vm436_vm4, %v499_v50, 0.0  ;;  %v501_v4 = vmul.f32 %v298_v1, %v298_v1 }
  0x25   : > { %725 = vmatpush3.bf16.msra.mxu0 %v722_v9  ;;  %756 = vmatpush3.bf16.msra.mxu1 %v722_v9  ;;  %v514_v51 = vsel %vm474_vm3, %v506_v48, 0.0  ;;  %v513_v52 = vsel %vm474_vm3, %v505_v49, 0.0  ;;  %v516_v59 = vsel %vm474_vm3, %v507_v57, 0.0  ;;  %v508_v62 = vsel %vm437_vm5, %v500_v56, 0.0 }
  0x26   : > { %727 = vmatprep.subr.bf16.mxu0 %v726_v14  ;;  %749 = vmatprep.subr.bf16.mxu1 %v726_v14  ;;  %v515_v55 = vadd.f32 %v514_v51, %v513_v52  ;;  %v518_v3 = vsel %vm474_vm3, %v508_v62, 0.0  ;;  %v510_v6 = vsel %vm439_vm6, %v502_v0, 0.0  ;;  %vm438_vm7 = vcmp.lt.s32.totalorder %v1021_v2, 256 }
  0x27   : > { %v522_v9 = vsel %vm474_vm3, %v510_v6, 0.0  ;;  %v509_v10 = vsel %vm438_vm7, %v501_v4, 0.0  ;;  %v1032_v12 = vadd.s32 %v425_v36, %v424_v5  ;;  %v504_v15 = vmul.f32 %v301_v11, %v301_v11 }
  0x28   : > { %v517_v63 = vadd.f32 %v516_v59, %v515_v55  ;;  %v432_v16 = vadd.s32 %v425_v36, %v423_v8 }
  0x29   : > { %729 = vmatpush3.bf16.msra.mxu0 %v726_v14  ;;  %757 = vmatpush3.bf16.msra.mxu1 %v726_v14  ;;  %v520_v14 = vsel %vm474_vm3, %v509_v10, 0.0  ;;  %vm441_vm8 = vcmp.lt.s32.totalorder %v1032_v12, 256 }
  0x2a   : > { %731 = vmatprep.subr.bf16.mxu0 %v730_v17  ;;  %750 = vmatprep.subr.bf16.mxu1 %v730_v17  ;;  %v519_v7 = vadd.f32 %v518_v3, %v517_v63  ;;  %v512_v19 = vsel %vm441_vm8, %v504_v15, 0.0  ;;  %vm440_vm9 = vcmp.lt.s32.totalorder %v432_v16, 256  ;;  %v535_v16 = vld [vmem:[#allocation2] sm:$0x1] }
  0x2b   : > { %v526_v22 = vsel %vm474_vm3, %v512_v19, 0.0 }
  0x2c   : > { %v521_v18 = vadd.f32 %v520_v14, %v519_v7 }
  0x2d   : > { %733 = vmatpush3.bf16.msra.mxu0 %v730_v17  ;;  %758 = vmatpush3.bf16.msra.mxu1 %v730_v17  ;;  %v503_v17 = vmul.f32 %v300_v13, %v300_v13 }
  0x2e   : > { %735 = vmatprep.subr.bf16.mxu0 %v734_v20  ;;  %751 = vmatprep.subr.bf16.mxu1 %v734_v20  ;;  %v523_v21 = vadd.f32 %v522_v9, %v521_v18 }
  0x31   : > { %737 = vmatpush3.bf16.msra.mxu0 %v734_v20  ;;  %759 = vmatpush3.bf16.msra.mxu1 %v734_v20  ;;  %v511_v20 = vsel %vm440_vm9, %v503_v17, 0.0 }
  0x32   : > { %739 = vmatprep.subr.bf16.mxu0 %v738_v23  ;;  %752 = vmatprep.subr.bf16.mxu1 %v738_v23 }
  0x35   : > { %741 = vmatpush3.bf16.msra.mxu0 %v738_v23  ;;  %760 = vmatpush3.bf16.msra.mxu1 %v738_v23  ;;  %v524_v23 = vsel %vm474_vm3, %v511_v20, 0.0 }
  0x36   : > { %743 = vmatprep.subr.bf16.mxu0 %v742_v26  ;;  %753 = vmatprep.subr.bf16.mxu1 %v742_v26  ;;  %v525_v24 = vadd.f32 %v524_v23, %v523_v21 }
  0x38   : > { %v527_v25 = vadd.f32 %v526_v22, %v525_v24 }
  0x39   : > { %745 = vmatpush3.bf16.msra.mxu0 %v742_v26  ;;  %761 = vmatpush3.bf16.msra.mxu1 %v742_v26 }
  0x3a   : > { %v528_v26 = vrot.slane %v527_v25, 4 }
  0x3c   : > { %703 = vmatmul.mubr.f32.vlgmr.msra.gmra.mrb[0].mxu0 %v287_v27  ;;  %709 = vmatmul.mubr.f32.vlgmr.msra.gmra.mrb[0].mxu1 %v291_v28  ;;  %v529_v27 = vadd.f32 %v528_v26, %v527_v25 }
  0x3d   : > { %705 = vmatprep.mubr.f32.mxu0 %v288_v29  ;;  %711 = vmatprep.mubr.f32.mxu1 %v292_v30 }
  0x3e   : > { %v530_v28 = vrot.slane %v529_v27, 2 }
  0x40   : > { %706 = vmatmul.mubr.f32.gmra.mrb[2].mxu0 %v289_v31  ;;  %712 = vmatmul.mubr.f32.gmra.mrb[2].mxu1 %v293_v32  ;;  %v531_v29 = vadd.f32 %v530_v28, %v529_v27  ;;  %v539_v32 = vld [vmem:[#allocation2 + $0x1] sm:$0x1] }
  0x42   : > { %v532_v30 = vrot.slane %v531_v29, 1 }
  0x44   : > { %v533_v31 = vadd.f32 %v532_v30, %v531_v29 }
  0x46   : > { %v540_v33 = vadd.f32 %v539_v32, %v533_v31 }
  0x48   : > { %541 = vst.msk [vmem:[#allocation2 + $0x1] sm:$0x1] %vm537_vm10, %v540_v33 }
 0x10f   : > { %v704_v34 = vpop.f32.mrb[0].mxu0  ;;  %v710_v35 = vpop.f32.mrb[0].mxu1 }
 0x110   : > { %v408_v36 = vsub.f32 %v979_v40, %v704_v34  ;;  %v368_v39 = vpop.f32.mrb[1].mxu0  ;;  %v388_v42 = vpop.f32.mrb[1].mxu1  ;;  %v412_v56 = vsub.f32 %v299_v60, %v710_v35 }
 0x111   : > { %v407_v43 = vsub.f32 %v982_v41, %v368_v39  ;;  %v411_v44 = vsub.f32 %v298_v1, %v388_v42 }
 0x112   : > { %v443_v48 = vmul.f32 %v408_v36, %v408_v36  ;;  %v447_v3 = vmul.f32 %v412_v56, %v412_v56 }
 0x113   : > { %v442_v49 = vmul.f32 %v407_v43, %v407_v43  ;;  %v707_v50 = vpop.f32.mrb[2].mxu0  ;;  %v713_v51 = vpop.f32.mrb[2].mxu1  ;;  %v446_v59 = vmul.f32 %v411_v44, %v411_v44 }
 0x114   : > { %v467_v52 = vsel %vm435_vm1, %v443_v48, 0.0  ;;  %v410_v54 = vsub.f32 %v1006_v53, %v707_v50  ;;  %v378_v55 = vpop.f32.mrb[3].mxu0  ;;  %v398_v57 = vpop.f32.mrb[3].mxu1  ;;  %v414_v4 = vsub.f32 %v301_v11, %v713_v51  ;;  %v471_v9 = vsel %vm439_vm6, %v447_v3, 0.0 }
 0x115   : > { %v476_v58 = vsel %vm474_vm3, %v467_v52, 0.0  ;;  %v466_v40 = vsel %vm434_vm2, %v442_v49, 0.0  ;;  %v409_v41 = vsub.f32 %v993_v46, %v378_v55  ;;  %v413_v37 = vsub.f32 %v300_v13, %v398_v57 }
 0x116   : > { %v475_v62 = vsel %vm474_vm3, %v466_v40, 0.0  ;;  %v445_v63 = vmul.f32 %v410_v54, %v410_v54  ;;  %v470_v38 = vsel %vm438_vm7, %v446_v59, 0.0  ;;  %v449_v45 = vmul.f32 %v414_v4, %v414_v4 }
 0x117   : > { %v477_v0 = vadd.f32 %v476_v58, %v475_v62  ;;  %v444_v1 = vmul.f32 %v409_v41, %v409_v41  ;;  %v448_v5 = vmul.f32 %v413_v37, %v413_v37  ;;  %v482_v8 = vsel %vm474_vm3, %v470_v38, 0.0 }
 0x118   : > { %v469_v53 = vsel %vm437_vm5, %v445_v63, 0.0  ;;  %v484_v13 = vsel %vm474_vm3, %v471_v9, 0.0  ;;  %v473_v14 = vsel %vm441_vm8, %v449_v45, 0.0 }
 0x119   : > { %v468_v60 = vsel %vm436_vm4, %v444_v1, 0.0  ;;  %v480_v7 = vsel %vm474_vm3, %v469_v53, 0.0  ;;  %v472_v11 = vsel %vm440_vm9, %v448_v5, 0.0  ;;  %v488_v18 = vsel %vm474_vm3, %v473_v14, 0.0 }
 0x11a   : > { %v478_v46 = vsel %vm474_vm3, %v468_v60, 0.0  ;;  %v486_v2 = vsel %vm474_vm3, %v472_v11, 0.0 }
 0x11b   : > { %v479_v6 = vadd.f32 %v478_v46, %v477_v0 }
 0x11d   : > { %v481_v10 = vadd.f32 %v480_v7, %v479_v6 }
 0x11f   : > { %v483_v47 = vadd.f32 %v482_v8, %v481_v10 }
 0x121   : > { %v485_v15 = vadd.f32 %v484_v13, %v483_v47 }
 0x123   : > { %v487_v17 = vadd.f32 %v486_v2, %v485_v15 }
 0x125   : > { %v489_v19 = vadd.f32 %v488_v18, %v487_v17 }
 0x127   : > { %v490_v20 = vrot.slane %v489_v19, 4 }
 0x129   : > { %v491_v61 = vadd.f32 %v490_v20, %v489_v19 }
 0x12b   : > { %v492_v21 = vrot.slane %v491_v61, 2 }
 0x12d   : > { %v493_v22 = vadd.f32 %v492_v21, %v491_v61 }
 0x12f   : > { %v494_v23 = vrot.slane %v493_v22, 1  ;;  %545 = sbr.rel (%p643_p9) target bundleno = 318 (0x13e), region = 40 }
 0x131   : > { %v495_v24 = vadd.f32 %v494_v23, %v493_v22 }
 0x133   : > { %v536_v25 = vadd.f32 %v535_v16, %v495_v24 }
 0x135   : > { %538 = vst.msk [vmem:[#allocation2] sm:$0x1] %vm537_vm10, %v536_v25 }
 0x13c   : > { %v546_v12 = vld [vmem:[#allocation2] sm:$0xff] }
 0x13d   : > { %547 = vst.msk [vmem:[%s904_s26] sm:$0xff] %vm474_vm3, %v546_v12 }
 0x13e PF: > { %s13_s16 = sadd.s32 1, %s841_s16   ;;  %s1093_s12 = smov %s833_s14 }
 0x13f   : > { %p10_p10 = scmp.ge.s32.totalorder %s13_s16, 6   ;;  %s1094_s13 = smov %s837_s15 }
 0x140   : > { %s1095_s14 = smov %s1098_s17  ;;  %s1096_s15 = smov %s1102_s18 }
 0x141   :  { %12 = sbr.rel (!%p10_p10) target bundleno = 3 (0x3), region = 73 }

</bundles_post_ra>
